<compile_context>
chip_gen: v5e
topology: v5e:2x2
jax: 0.10.0
libtpu: 0.0.40
codegen_flags: <defaults>
</compile_context>

<pallas_src>
import functools

import jax
import jax.numpy as jnp
from jax.experimental import pallas as pl
from jax.experimental.pallas import tpu as pltpu

LN_EPS = 1e-5  # torch.nn.LayerNorm default


def _layernorm(x, gamma, beta):
    # Single-pass LN: both lane reductions issue without the mean dependency.
    inv_n = 1.0 / x.shape[-1]
    s = jnp.sum(x, axis=-1, keepdims=True)
    sq = jnp.sum(x * x, axis=-1, keepdims=True)
    mu = s * inv_n
    var = sq * inv_n - mu * mu
    return (x - mu) * jax.lax.rsqrt(var + LN_EPS) * gamma + beta


def dqn_kernel(state_ref, action_ref, w1_ref, w2_ref, wa_ref, pvec_ref, bq_ref, out_ref):
    # Packed per-feature rows: [b1, g1, be1, b2, g2, be2, ba, wq^T] -> [8, H] f32
    p = pvec_ref[...]
    b1, g1, be1 = p[0:1, :], p[1:2, :], p[2:3, :]
    b2, g2, be2 = p[3:4, :], p[4:5, :], p[5:6, :]
    ba, wq_t = p[6:7, :], p[7:8, :]

    s = state_ref[...].astype(jnp.bfloat16)
    a = action_ref[...].astype(jnp.bfloat16)

    # Action branch first (tiny K=action_dim) so its MXU work hides under LN VPU work.
    av = jnp.dot(a, wa_ref[...], preferred_element_type=jnp.float32) + ba
    av = jnp.maximum(av, 0.0)

    # fc1 -> LayerNorm -> ReLU   (bf16 MXU inputs, f32 accumulation / LN stats)
    x = jnp.dot(s, w1_ref[...], preferred_element_type=jnp.float32) + b1
    x = _layernorm(x, g1, be1)
    x = jnp.maximum(x, 0.0)

    # fc2 -> LayerNorm (no ReLU on the state branch, matching the torch code)
    x = jnp.dot(x.astype(jnp.bfloat16), w2_ref[...],
                preferred_element_type=jnp.float32) + b2
    x = _layernorm(x, g2, be2)

    # Combine + ReLU, then Q head as VPU multiply + lane reduce (N=1 head).
    sa = jnp.maximum(x + av, 0.0)
    q = jnp.sum(sa * wq_t, axis=-1, keepdims=True) + bq_ref[0, 0]
    out_ref[...] = q.astype(out_ref.dtype)


def _round_up(x, m):
    return (x + m - 1) // m * m


@functools.partial(jax.jit, static_argnames=("tile_m",))
def dqn_forward(state, action, params, tile_m=256):
    B, state_dim = state.shape
    action_dim = action.shape[1]
    H1 = params["w1"].shape[1]
    H2 = params["w2"].shape[1]
    assert H1 == H2, "packed per-feature params assume hidden_dim1 == hidden_dim2"
    H = H2

    # Batch tiling: TM rows per grid step (multiple of 8 for the sublane tile).
    tm = min(tile_m, _round_up(B, 8))
    bp = _round_up(B, tm)
    if bp != B:
        pad = ((0, bp - B), (0, 0))
        state = jnp.pad(state, pad)
        action = jnp.pad(action, pad)

    # bf16 weights for the MXU (f32 accumulation happens in-kernel).
    w1 = params["w1"].astype(jnp.bfloat16)
    w2 = params["w2"].astype(jnp.bfloat16)
    wa = params["wa"].astype(jnp.bfloat16)

    # One packed [8, H] f32 buffer: b1,g1,be1,b2,g2,be2,ba,wq^T.
    pvec = jnp.concatenate(
        [params["b1"], params["g1"], params["be1"],
         params["b2"], params["g2"], params["be2"],
         params["ba"], params["wq"].T],
        axis=0,
    ).astype(jnp.float32)
    bq = params["bq"].astype(jnp.float32).reshape(1, 1)

    out = pl.pallas_call(
        dqn_kernel,
        out_shape=jax.ShapeDtypeStruct((bp, 1), jnp.float32),
        grid=(bp // tm,),
        in_specs=[
            pl.BlockSpec((tm, state_dim), lambda i: (i, 0)),
            pl.BlockSpec((tm, action_dim), lambda i: (i, 0)),
            pl.BlockSpec((state_dim, H), lambda i: (0, 0)),   # VMEM-resident weights
            pl.BlockSpec((H, H), lambda i: (0, 0)),
            pl.BlockSpec((action_dim, H), lambda i: (0, 0)),
            pl.BlockSpec((8, H), lambda i: (0, 0)),
            pl.BlockSpec(memory_space=pltpu.MemorySpace.SMEM),  # bq scalar
        ],
        out_specs=pl.BlockSpec((tm, 1), lambda i: (i, 0)),
        compiler_params=pltpu.CompilerParams(
            dimension_semantics=("parallel",),
            vmem_limit_bytes=32 * 1024 * 1024,
        ),
    )(state, action, w1, w2, wa, pvec, bq)
    return out[:B]


def init_params(key, state_dim, action_dim, hidden_dim1=256, hidden_dim2=256):
    """Deterministic init mirroring the PyTorch __init__ ranges (kept in f32)."""
    ks = jax.random.split(key, 8)

    f1 = 1.0 / jnp.sqrt(jnp.float32(hidden_dim1))
    w1 = jax.random.uniform(ks[0], (state_dim, hidden_dim1), jnp.float32, -f1, f1)
    b1 = jax.random.uniform(ks[1], (1, hidden_dim1), jnp.float32, -f1, f1)

    f2 = 1.0 / jnp.sqrt(jnp.float32(hidden_dim2))
    w2 = jax.random.uniform(ks[2], (hidden_dim1, hidden_dim2), jnp.float32, -f2, f2)
    b2 = jax.random.uniform(ks[3], (1, hidden_dim2), jnp.float32, -f2, f2)

    fa = 1.0 / jnp.sqrt(jnp.float32(action_dim))
    wa = jax.random.uniform(ks[4], (action_dim, hidden_dim2), jnp.float32, -fa, fa)
    ba = jax.random.uniform(ks[5], (1, hidden_dim2), jnp.float32, -fa, fa)

    f3 = 0.003
    wq = jax.random.uniform(ks[6], (hidden_dim2, 1), jnp.float32, -f3, f3)
    bq = jax.random.uniform(ks[7], (1, 1), jnp.float32, -f3, f3)

    g1 = jnp.ones((1, hidden_dim1), jnp.float32)
    be1 = jnp.zeros((1, hidden_dim1), jnp.float32)
    g2 = jnp.ones((1, hidden_dim2), jnp.float32)
    be2 = jnp.zeros((1, hidden_dim2), jnp.float32)

    return dict(w1=w1, b1=b1, g1=g1, be1=be1,
                w2=w2, b2=b2, g2=g2, be2=be2,
                wa=wa, ba=ba, wq=wq, bq=bq)


def dqn_forward_ref_bf16(state, action, p):
    """Pure-JAX reference that mirrors the kernel math (bf16 MXU inputs)."""
    bf = jnp.bfloat16
    x = jnp.dot(state.astype(bf), p["w1"].astype(bf),
                preferred_element_type=jnp.float32) + p["b1"]
    x = _layernorm(x, p["g1"], p["be1"])
    x = jnp.maximum(x, 0.0)
    x = jnp.dot(x.astype(bf), p["w2"].astype(bf),
                preferred_element_type=jnp.float32) + p["b2"]
    x = _layernorm(x, p["g2"], p["be2"])
    av = jnp.maximum(
        jnp.dot(action.astype(bf), p["wa"].astype(bf),
                preferred_element_type=jnp.float32) + p["ba"], 0.0)
    sa = jnp.maximum(x + av, 0.0)
    return jnp.sum(sa * p["wq"].T, axis=-1, keepdims=True) + p["bq"]


def dqn_forward_ref_f32(state, action, p):
    """Full-precision reference (loose tolerance vs the bf16-matmul kernel)."""
    x = state @ p["w1"] + p["b1"]
    x = _layernorm(x, p["g1"], p["be1"])
    x = jnp.maximum(x, 0.0)
    x = x @ p["w2"] + p["b2"]
    x = _layernorm(x, p["g2"], p["be2"])
    av = jnp.maximum(action @ p["wa"] + p["ba"], 0.0)
    sa = jnp.maximum(x + av, 0.0)
    return sa @ p["wq"] + p["bq"]


if __name__ == "__main__":
    B, STATE_DIM, ACTION_DIM, H1, H2 = 8, 16, 4, 256, 256

    key = jax.random.PRNGKey(0)
    k_state, k_action, k_params = jax.random.split(key, 3)

    state = jax.random.normal(k_state, (B, STATE_DIM), jnp.float32)
    action = jax.random.normal(k_action, (B, ACTION_DIM), jnp.float32)
    params = init_params(k_params, STATE_DIM, ACTION_DIM, H1, H2)

    q = dqn_forward(state, action, params)
    jax.block_until_ready(q)
    assert q.shape == (B, 1)

    # Tight check against a reference using the same bf16 matmul inputs.
    q_ref = dqn_forward_ref_bf16(state, action, params)
    assert jnp.allclose(q, q_ref, atol=2e-3, rtol=2e-3), (q, q_ref)

    # Loose sanity check against the full-f32 reference (bf16 quantization).
    q_f32 = dqn_forward_ref_f32(state, action, params)
    assert jnp.allclose(q, q_f32, atol=5e-2, rtol=5e-2), (q, q_f32)

    print("KERNEL_OK")
</pallas_src>

<mosaic_0001>
module attributes {stable_mosaic.version = 11 : i64} {
  func.func @dqn_kernel(%arg0: i32, %arg1: memref<8x16xf32, #tpu.memory_space<vmem>>, %arg2: memref<8x4xf32, #tpu.memory_space<vmem>>, %arg3: memref<16x256xbf16, #tpu.memory_space<vmem>>, %arg4: memref<256x256xbf16, #tpu.memory_space<vmem>>, %arg5: memref<4x256xbf16, #tpu.memory_space<vmem>>, %arg6: memref<8x256xf32, #tpu.memory_space<vmem>>, %arg7: memref<1x1xf32, #tpu.memory_space<smem>>, %arg8: memref<8x1xf32, #tpu.memory_space<vmem>>) attributes {dimension_semantics = [#tpu.dimension_semantics<parallel>], iteration_bounds = array<i64: 1>, scalar_prefetch = 0 : i64, scratch_operands = 0 : i64, tpu.core_type = #tpu.core_type<tc>, window_params = [{transform_indices = @transform_0, window_bounds = array<i64: 8, 16>}, {transform_indices = @transform_1, window_bounds = array<i64: 8, 4>}, {pipeline_mode = #tpu.pipeline_mode<synchronous>, transform_indices = @transform_2, window_bounds = array<i64: 16, 256>}, {pipeline_mode = #tpu.pipeline_mode<synchronous>, transform_indices = @transform_3, window_bounds = array<i64: 256, 256>}, {pipeline_mode = #tpu.pipeline_mode<synchronous>, transform_indices = @transform_4, window_bounds = array<i64: 4, 256>}, {pipeline_mode = #tpu.pipeline_mode<synchronous>, transform_indices = @transform_5, window_bounds = array<i64: 8, 256>}, {transform_indices = @transform_6, window_bounds = array<i64: 1, 1>}, {transform_indices = @transform_7, window_bounds = array<i64: 8, 1>}]} {
    %c0 = arith.constant 0 : index
    %c0_0 = arith.constant 0 : index
    %0 = vector.load %arg6[%c0, %c0_0] : memref<8x256xf32, #tpu.memory_space<vmem>>, vector<8x256xf32>
    %1 = vector.extract_strided_slice %0 {offsets = [0, 0], sizes = [1, 256], strides = [1, 1]} : vector<8x256xf32> to vector<1x256xf32>
    %2 = vector.extract_strided_slice %0 {offsets = [1, 0], sizes = [1, 256], strides = [1, 1]} : vector<8x256xf32> to vector<1x256xf32>
    %3 = vector.extract_strided_slice %0 {offsets = [2, 0], sizes = [1, 256], strides = [1, 1]} : vector<8x256xf32> to vector<1x256xf32>
    %4 = vector.extract_strided_slice %0 {offsets = [3, 0], sizes = [1, 256], strides = [1, 1]} : vector<8x256xf32> to vector<1x256xf32>
    %5 = vector.extract_strided_slice %0 {offsets = [4, 0], sizes = [1, 256], strides = [1, 1]} : vector<8x256xf32> to vector<1x256xf32>
    %6 = vector.extract_strided_slice %0 {offsets = [5, 0], sizes = [1, 256], strides = [1, 1]} : vector<8x256xf32> to vector<1x256xf32>
    %7 = vector.extract_strided_slice %0 {offsets = [6, 0], sizes = [1, 256], strides = [1, 1]} : vector<8x256xf32> to vector<1x256xf32>
    %8 = vector.extract_strided_slice %0 {offsets = [7, 0], sizes = [1, 256], strides = [1, 1]} : vector<8x256xf32> to vector<1x256xf32>
    %c0_1 = arith.constant 0 : index
    %c0_2 = arith.constant 0 : index
    %9 = vector.load %arg1[%c0_1, %c0_2] : memref<8x16xf32, #tpu.memory_space<vmem>>, vector<8x16xf32>
    %10 = arith.truncf %9 : vector<8x16xf32> to vector<8x16xbf16>
    %c0_3 = arith.constant 0 : index
    %c0_4 = arith.constant 0 : index
    %11 = vector.load %arg2[%c0_3, %c0_4] : memref<8x4xf32, #tpu.memory_space<vmem>>, vector<8x4xf32>
    %12 = arith.truncf %11 : vector<8x4xf32> to vector<8x4xbf16>
    %c0_5 = arith.constant 0 : index
    %c0_6 = arith.constant 0 : index
    %13 = vector.load %arg5[%c0_5, %c0_6] : memref<4x256xbf16, #tpu.memory_space<vmem>>, vector<4x256xbf16>
    %cst = arith.constant dense<0.000000e+00> : vector<8x256xf32>
    %14 = tpu.matmul %12, %13, %cst {dimension_numbers = #tpu.dot_dimension_numbers<[1], [0], [0], [1], [0, 0, 1, 1], [], []>} : vector<8x4xbf16>, vector<4x256xbf16>, vector<8x256xf32> -> vector<8x256xf32>
    %15 = vector.broadcast %7 : vector<1x256xf32> to vector<8x256xf32>
    %16 = arith.addf %14, %15 : vector<8x256xf32>
    %cst_7 = arith.constant 0.000000e+00 : f32
    %17 = vector.broadcast %cst_7 : f32 to vector<8x256xf32>
    %18 = arith.maximumf %16, %17 : vector<8x256xf32>
    %c0_8 = arith.constant 0 : index
    %c0_9 = arith.constant 0 : index
    %19 = vector.load %arg3[%c0_8, %c0_9] : memref<16x256xbf16, #tpu.memory_space<vmem>>, vector<16x256xbf16>
    %cst_10 = arith.constant dense<0.000000e+00> : vector<8x256xf32>
    %20 = tpu.matmul %10, %19, %cst_10 {dimension_numbers = #tpu.dot_dimension_numbers<[1], [0], [0], [1], [0, 0, 1, 1], [], []>} : vector<8x16xbf16>, vector<16x256xbf16>, vector<8x256xf32> -> vector<8x256xf32>
    %21 = vector.broadcast %1 : vector<1x256xf32> to vector<8x256xf32>
    %22 = arith.addf %20, %21 : vector<8x256xf32>
    %cst_11 = arith.constant dense<0.000000e+00> : vector<8xf32>
    %23 = vector.multi_reduction <add>, %22, %cst_11 [1] : vector<8x256xf32> to vector<8xf32>
    %24 = vector.shape_cast %23 : vector<8xf32> to vector<8x1xf32>
    %25 = arith.mulf %22, %22 : vector<8x256xf32>
    %cst_12 = arith.constant dense<0.000000e+00> : vector<8xf32>
    %26 = vector.multi_reduction <add>, %25, %cst_12 [1] : vector<8x256xf32> to vector<8xf32>
    %27 = vector.shape_cast %26 : vector<8xf32> to vector<8x1xf32>
    %cst_13 = arith.constant 3.906250e-03 : f32
    %28 = vector.broadcast %cst_13 : f32 to vector<8x1xf32>
    %29 = arith.mulf %24, %28 : vector<8x1xf32>
    %cst_14 = arith.constant 3.906250e-03 : f32
    %30 = vector.broadcast %cst_14 : f32 to vector<8x1xf32>
    %31 = arith.mulf %27, %30 : vector<8x1xf32>
    %32 = arith.mulf %29, %29 : vector<8x1xf32>
    %33 = arith.subf %31, %32 : vector<8x1xf32>
    %34 = vector.broadcast %29 : vector<8x1xf32> to vector<8x256xf32>
    %35 = arith.subf %22, %34 : vector<8x256xf32>
    %cst_15 = arith.constant 9.99999974E-6 : f32
    %36 = vector.broadcast %cst_15 : f32 to vector<8x1xf32>
    %37 = arith.addf %33, %36 : vector<8x1xf32>
    %38 = math.rsqrt %37 : vector<8x1xf32>
    %39 = vector.broadcast %38 : vector<8x1xf32> to vector<8x256xf32>
    %40 = arith.mulf %35, %39 : vector<8x256xf32>
    %41 = vector.broadcast %2 : vector<1x256xf32> to vector<8x256xf32>
    %42 = arith.mulf %40, %41 : vector<8x256xf32>
    %43 = vector.broadcast %3 : vector<1x256xf32> to vector<8x256xf32>
    %44 = arith.addf %42, %43 : vector<8x256xf32>
    %cst_16 = arith.constant 0.000000e+00 : f32
    %45 = vector.broadcast %cst_16 : f32 to vector<8x256xf32>
    %46 = arith.maximumf %44, %45 : vector<8x256xf32>
    %47 = arith.truncf %46 : vector<8x256xf32> to vector<8x256xbf16>
    %c0_17 = arith.constant 0 : index
    %c0_18 = arith.constant 0 : index
    %48 = vector.load %arg4[%c0_17, %c0_18] : memref<256x256xbf16, #tpu.memory_space<vmem>>, vector<256x256xbf16>
    %cst_19 = arith.constant dense<0.000000e+00> : vector<8x256xf32>
    %49 = tpu.matmul %47, %48, %cst_19 {dimension_numbers = #tpu.dot_dimension_numbers<[1], [0], [0], [1], [0, 0, 1, 1], [], []>} : vector<8x256xbf16>, vector<256x256xbf16>, vector<8x256xf32> -> vector<8x256xf32>
    %50 = vector.broadcast %4 : vector<1x256xf32> to vector<8x256xf32>
    %51 = arith.addf %49, %50 : vector<8x256xf32>
    %cst_20 = arith.constant dense<0.000000e+00> : vector<8xf32>
    %52 = vector.multi_reduction <add>, %51, %cst_20 [1] : vector<8x256xf32> to vector<8xf32>
    %53 = vector.shape_cast %52 : vector<8xf32> to vector<8x1xf32>
    %54 = arith.mulf %51, %51 : vector<8x256xf32>
    %cst_21 = arith.constant dense<0.000000e+00> : vector<8xf32>
    %55 = vector.multi_reduction <add>, %54, %cst_21 [1] : vector<8x256xf32> to vector<8xf32>
    %56 = vector.shape_cast %55 : vector<8xf32> to vector<8x1xf32>
    %cst_22 = arith.constant 3.906250e-03 : f32
    %57 = vector.broadcast %cst_22 : f32 to vector<8x1xf32>
    %58 = arith.mulf %53, %57 : vector<8x1xf32>
    %cst_23 = arith.constant 3.906250e-03 : f32
    %59 = vector.broadcast %cst_23 : f32 to vector<8x1xf32>
    %60 = arith.mulf %56, %59 : vector<8x1xf32>
    %61 = arith.mulf %58, %58 : vector<8x1xf32>
    %62 = arith.subf %60, %61 : vector<8x1xf32>
    %63 = vector.broadcast %58 : vector<8x1xf32> to vector<8x256xf32>
    %64 = arith.subf %51, %63 : vector<8x256xf32>
    %cst_24 = arith.constant 9.99999974E-6 : f32
    %65 = vector.broadcast %cst_24 : f32 to vector<8x1xf32>
    %66 = arith.addf %62, %65 : vector<8x1xf32>
    %67 = math.rsqrt %66 : vector<8x1xf32>
    %68 = vector.broadcast %67 : vector<8x1xf32> to vector<8x256xf32>
    %69 = arith.mulf %64, %68 : vector<8x256xf32>
    %70 = vector.broadcast %5 : vector<1x256xf32> to vector<8x256xf32>
    %71 = arith.mulf %69, %70 : vector<8x256xf32>
    %72 = vector.broadcast %6 : vector<1x256xf32> to vector<8x256xf32>
    %73 = arith.addf %71, %72 : vector<8x256xf32>
    %74 = arith.addf %73, %18 : vector<8x256xf32>
    %cst_25 = arith.constant 0.000000e+00 : f32
    %75 = vector.broadcast %cst_25 : f32 to vector<8x256xf32>
    %76 = arith.maximumf %74, %75 : vector<8x256xf32>
    %77 = vector.broadcast %8 : vector<1x256xf32> to vector<8x256xf32>
    %78 = arith.mulf %76, %77 : vector<8x256xf32>
    %cst_26 = arith.constant dense<0.000000e+00> : vector<8xf32>
    %79 = vector.multi_reduction <add>, %78, %cst_26 [1] : vector<8x256xf32> to vector<8xf32>
    %80 = vector.shape_cast %79 : vector<8xf32> to vector<8x1xf32>
    %c0_27 = arith.constant 0 : index
    %c0_28 = arith.constant 0 : index
    %81 = memref.load %arg7[%c0_27, %c0_28] : memref<1x1xf32, #tpu.memory_space<smem>>
    %82 = vector.broadcast %81 : f32 to vector<8x1xf32>
    %83 = arith.addf %80, %82 : vector<8x1xf32>
    %c0_29 = arith.constant 0 : index
    %c0_30 = arith.constant 0 : index
    %84 = vector.load %arg8[%c0_29, %c0_30] : memref<8x1xf32, #tpu.memory_space<vmem>>, vector<8x1xf32>
    tpu.vector_store %arg8[%c0_29, %c0_30], %83 {strides = array<i32>} : memref<8x1xf32, #tpu.memory_space<vmem>>, vector<8x1xf32>,
    return
  }
  func.func @transform_0(%arg0: i32) -> (i32, i32) {
    %c0_i32 = arith.constant 0 : i32
    %c0_i32_0 = arith.constant 0 : i32
    return %arg0, %c0_i32 : i32, i32
  }
  func.func @transform_1(%arg0: i32) -> (i32, i32) {
    %c0_i32 = arith.constant 0 : i32
    %c0_i32_0 = arith.constant 0 : i32
    return %arg0, %c0_i32 : i32, i32
  }
  func.func @transform_2(%arg0: i32) -> (i32, i32) {
    %c0_i32 = arith.constant 0 : i32
    %c0_i32_0 = arith.constant 0 : i32
    %c0_i32_1 = arith.constant 0 : i32
    return %c0_i32, %c0_i32_0 : i32, i32
  }
  func.func @transform_3(%arg0: i32) -> (i32, i32) {
    %c0_i32 = arith.constant 0 : i32
    %c0_i32_0 = arith.constant 0 : i32
    %c0_i32_1 = arith.constant 0 : i32
    return %c0_i32, %c0_i32_0 : i32, i32
  }
  func.func @transform_4(%arg0: i32) -> (i32, i32) {
    %c0_i32 = arith.constant 0 : i32
    %c0_i32_0 = arith.constant 0 : i32
    %c0_i32_1 = arith.constant 0 : i32
    return %c0_i32, %c0_i32_0 : i32, i32
  }
  func.func @transform_5(%arg0: i32) -> (i32, i32) {
    %c0_i32 = arith.constant 0 : i32
    %c0_i32_0 = arith.constant 0 : i32
    %c0_i32_1 = arith.constant 0 : i32
    return %c0_i32, %c0_i32_0 : i32, i32
  }
  func.func @transform_6(%arg0: i32) -> (i32, i32) {
    %c0_i32 = arith.constant 0 : i32
    %c0_i32_0 = arith.constant 0 : i32
    %c0_i32_1 = arith.constant 0 : i32
    return %c0_i32, %c0_i32_0 : i32, i32
  }
  func.func @transform_7(%arg0: i32) -> (i32, i32) {
    %c0_i32 = arith.constant 0 : i32
    %c0_i32_0 = arith.constant 0 : i32
    return %arg0, %c0_i32 : i32, i32
  }
}

</mosaic_0001>

<bundles_post_ra>
// kernel: dqn_forward.1
= control target key start
LH: loop header
LB: loop body
LE: loop exit
PB: predicated region body
PF: predicated region fallthrough
CT: control target
= control target key end

     0   :  { %vm92_vm0 = vcmask 130048   ;;  %vm45_vm1 = vcmask 1041408   ;;  %vm41_vm2 = vcmask 31744   ;;  %vm456_vm9 = vcmask 7168   ;;  %s937_s2 = inlined_call_operand.vmem [shape: bf16[16,256], index: 2, kind: input, shape index: {}]   ;;  %s938_s0 = inlined_call_operand.vmem [shape: f32[8,16], index: 0, kind: input, shape index: {}]   ;;  %s939_s5 = inlined_call_operand.vmem [shape: f32[8,256], index: 5, kind: input, shape index: {}]   ;;  %s940_s4 = inlined_call_operand.vmem [shape: bf16[4,256], index: 4, kind: input, shape index: {}]   ;;  %s941_s3 = inlined_call_operand.vmem [shape: bf16[256,256], index: 3, kind: input, shape index: {}]   ;;  %s942_s1 = inlined_call_operand.vmem [shape: f32[8,4], index: 1, kind: input, shape index: {}]   ;;  %s943_s6 = inlined_call_operand.<no memory space> [shape: f32[1,1], index: 6, kind: input, shape index: {}]   ;;  %s944_s7 = inlined_call_operand.vmem [shape: f32[8,1], index: 7, kind: output, shape index: {}]  }
   0x1   :  { %v466_v0 = vld [vmem:[%s937_s2] sm:$0xf]  ;;  %v603_v1 = vld [vmem:[%s937_s2 + $0x4] sm:$0xf0]  ;;  %v602_v2 = vld [vmem:[%s937_s2 + $0x4] sm:$0xf] }
   0x2   :  { %v467_v3 = vor.u32 %v603_v1, %v466_v0  ;;  %v468_v4 = vld [vmem:[%s937_s2 + $0x8] sm:$0xf0]  ;;  %v30_v5 = vld [vmem:[%s938_s0] sm:$0xff]  ;;  %v532_v24 = vld [vmem:[%s941_s3 + $0x70] sm:$0xf] }
   0x3   :  { %v471_v6 = vor.u32 %v602_v2, %v468_v4  ;;  %v31_v7 = vpack.c.bf16 %v30_v5, %v30_v5  ;;  %v698_v8 = vld [vmem:[%s939_s5] sm:$0xff]  ;;  %v703_v9 = vld [vmem:[%s939_s5 + $0x8] sm:$0xff]  ;;  %v619_v27 = vld [vmem:[%s941_s3 + $0x74] sm:$0xf0] }
   0x4   :  { %103 = vmatpush.bf16.msra.mxu2 %v467_v3  ;;  %v80_v10 = vperm.slane %v698_v8, 0  ;;  %v81_v11 = vperm.slane %v703_v9, 0  ;;  %v34_v22 = vld [vmem:[%s940_s4] sm:$0xf]  ;;  %v533_v29 = vor.u32 %v619_v27, %v532_v24  ;;  %v596_v30 = vld [vmem:[%s941_s3 + $0xf0] sm:$0xf] }
   0x5   :  { %116 = vmatpush.bf16.msra.mxu3 %v471_v6  ;;  %38 = vst [vmem:[#allocation1] ss:$4 sm:$0xff] %v34_v22  ;;  %v635_v31 = vld [vmem:[%s941_s3 + $0xf4] sm:$0xf0]  ;;  %v618_v33 = vld [vmem:[%s941_s3 + $0x74] sm:$0xf] }
   0x6   :  { %v597_v32 = vor.u32 %v635_v31, %v596_v30  ;;  %v534_v34 = vld [vmem:[%s941_s3 + $0x78] sm:$0xf0]  ;;  %v634_v35 = vld [vmem:[%s941_s3 + $0xf4] sm:$0xf]  ;;  %v524_v38 = vld [vmem:[%s941_s3 + $0x60] sm:$0xf] }
   0x7   :  { %472 = vmatmul.msk.bf16.vlgmr.msra.gmra.mxu2 %vm92_vm0, %v31_v7  ;;  %v537_v36 = vor.u32 %v618_v33, %v534_v34  ;;  %v598_v37 = vld [vmem:[%s941_s3 + $0xf8] sm:$0xf0]  ;;  %v617_v39 = vld [vmem:[%s941_s3 + $0x64] sm:$0xf0]  ;;  %v588_v42 = vld [vmem:[%s941_s3 + $0xe0] sm:$0xf] }
   0x8   :  { %473 = vmatmul.msk.bf16.vlgmr.msra.gmra.mxu3 %vm92_vm0, %v31_v7  ;;  %v601_v40 = vor.u32 %v634_v35, %v598_v37  ;;  %v525_v41 = vor.u32 %v617_v39, %v524_v38  ;;  %v633_v43 = vld [vmem:[%s941_s3 + $0xe4] sm:$0xf0]  ;;  %v616_v44 = vld [vmem:[%s941_s3 + $0x64] sm:$0xf]  ;;  %v526_v46 = vld [vmem:[%s941_s3 + $0x68] sm:$0xf0] }
   0x9   :  { %381 = vmatpush.bf16.msrb.mxu2 %v537_v36  ;;  %v589_v45 = vor.u32 %v633_v43, %v588_v42  ;;  %v632_v47 = vld [vmem:[%s941_s3 + $0xe4] sm:$0xf]  ;;  %v590_v48 = vld [vmem:[%s941_s3 + $0xe8] sm:$0xf0]  ;;  %v529_v49 = vor.u32 %v616_v44, %v526_v46  ;;  %v516_v51 = vld [vmem:[%s941_s3 + $0x50] sm:$0xf] }
   0xa   :  { %394 = vmatpush.bf16.msrb.mxu3 %v601_v40  ;;  %v593_v50 = vor.u32 %v632_v47, %v590_v48  ;;  %v615_v52 = vld [vmem:[%s941_s3 + $0x54] sm:$0xf0]  ;;  %v580_v53 = vld [vmem:[%s941_s3 + $0xd0] sm:$0xf]  ;;  %v614_v56 = vld [vmem:[%s941_s3 + $0x54] sm:$0xf] }
   0xb   :  { %v517_v54 = vor.u32 %v615_v52, %v516_v51  ;;  %v631_v55 = vld [vmem:[%s941_s3 + $0xd4] sm:$0xf0]  ;;  %v518_v57 = vld [vmem:[%s941_s3 + $0x58] sm:$0xf0]  ;;  %v630_v60 = vld [vmem:[%s941_s3 + $0xd4] sm:$0xf] }
   0xc   :  { %v39_v23 = vld.sshfl [vmem:[#allocation1] sm:$0xff pattern:$0x73625140]  ;;  %v40_v26 = vld.sshfl [vmem:[#allocation1 + $0x8] sm:$0xff pattern:$0x73625140]  ;;  %v581_v58 = vor.u32 %v631_v55, %v580_v53  ;;  %v521_v59 = vor.u32 %v614_v56, %v518_v57 }
   0xd   :  { %v46_v25 = vsel %vm45_vm1, %v39_v23, 0  ;;  %v48_v28 = vsel %vm45_vm1, %v40_v26, 0  ;;  %382 = vmatpush.bf16.msrb.mxu2 %v529_v49  ;;  %v582_v61 = vld [vmem:[%s941_s3 + $0xd8] sm:$0xf0]  ;;  %v508_v63 = vld [vmem:[%s941_s3 + $0x40] sm:$0xf] }
   0xe   :  { %57 = vmatpush.bf16.msra.mxu0 %v46_v25  ;;  %70 = vmatpush.bf16.msra.mxu1 %v48_v28  ;;  %v585_v62 = vor.u32 %v630_v60, %v582_v61  ;;  %v613_v0 = vld [vmem:[%s941_s3 + $0x44] sm:$0xf0]  ;;  %v572_v1 = vld [vmem:[%s941_s3 + $0xc0] sm:$0xf]  ;;  %v612_v4 = vld [vmem:[%s941_s3 + $0x44] sm:$0xf] }
   0xf   :  { %395 = vmatpush.bf16.msrb.mxu3 %v593_v50  ;;  %v509_v2 = vor.u32 %v613_v0, %v508_v63  ;;  %v629_v3 = vld [vmem:[%s941_s3 + $0xc4] sm:$0xf0]  ;;  %v510_v5 = vld [vmem:[%s941_s3 + $0x48] sm:$0xf0]  ;;  %v610_v22 = vld [vmem:[%s941_s3 + $0x34] sm:$0xf] }
  0x10   :  { %v573_v6 = vor.u32 %v629_v3, %v572_v1  ;;  %v513_v7 = vor.u32 %v612_v4, %v510_v5  ;;  %v502_v23 = vld [vmem:[%s941_s3 + $0x38] sm:$0xf0]  ;;  %v626_v26 = vld [vmem:[%s941_s3 + $0xb4] sm:$0xf]  ;;  %v609_v30 = vld [vmem:[%s941_s3 + $0x24] sm:$0xf0] }
  0x11   :  { %383 = vmatpush.bf16.msrb.mxu2 %v521_v59  ;;  %v505_v25 = vor.u32 %v610_v22, %v502_v23  ;;  %v566_v27 = vld [vmem:[%s941_s3 + $0xb8] sm:$0xf0]  ;;  %v556_v31 = vld [vmem:[%s941_s3 + $0xa0] sm:$0xf]  ;;  %v625_v33 = vld [vmem:[%s941_s3 + $0xa4] sm:$0xf0] }
  0x12   :  { %355 = vmatpush.bf16.msrb.mxu0 %v533_v29  ;;  %368 = vmatpush.bf16.msrb.mxu1 %v597_v32  ;;  %v569_v28 = vor.u32 %v626_v26, %v566_v27  ;;  %v492_v29 = vld [vmem:[%s941_s3 + $0x20] sm:$0xf]  ;;  %v608_v34 = vld [vmem:[%s941_s3 + $0x24] sm:$0xf]  ;;  %v494_v35 = vld [vmem:[%s941_s3 + $0x28] sm:$0xf0]  ;;  %v557_v36 = vor.u32 %v625_v33, %v556_v31 }
  0x13   :  { %396 = vmatpush.bf16.msrb.mxu3 %v585_v62  ;;  %v493_v32 = vor.u32 %v609_v30, %v492_v29  ;;  %v497_v37 = vor.u32 %v608_v34, %v494_v35  ;;  %v624_v38 = vld [vmem:[%s941_s3 + $0xa4] sm:$0xf]  ;;  %v558_v39 = vld [vmem:[%s941_s3 + $0xa8] sm:$0xf0]  ;;  %v484_v40 = vld [vmem:[%s941_s3 + $0x10] sm:$0xf] }
  0x14   :  { %v561_v42 = vor.u32 %v624_v38, %v558_v39  ;;  %v607_v43 = vld [vmem:[%s941_s3 + $0x14] sm:$0xf0]  ;;  %v548_v44 = vld [vmem:[%s941_s3 + $0x90] sm:$0xf]  ;;  %v606_v47 = vld [vmem:[%s941_s3 + $0x14] sm:$0xf] }
  0x15   :  { %384 = vmatpush.bf16.msrb.mxu2 %v513_v7  ;;  %v485_v46 = vor.u32 %v607_v43, %v484_v40  ;;  %v486_v48 = vld [vmem:[%s941_s3 + $0x18] sm:$0xf0]  ;;  %v622_v50 = vld [vmem:[%s941_s3 + $0x94] sm:$0xf]  ;;  %v476_v52 = vld [vmem:[%s941_s3] sm:$0xf] }
  0x16   :  { %356 = vmatpush.bf16.msrb.mxu0 %v525_v41  ;;  %369 = vmatpush.bf16.msrb.mxu1 %v589_v45  ;;  %v623_v45 = vld [vmem:[%s941_s3 + $0x94] sm:$0xf0]  ;;  %v550_v51 = vld [vmem:[%s941_s3 + $0x98] sm:$0xf0]  ;;  %v489_v53 = vor.u32 %v606_v47, %v486_v48  ;;  %v540_v55 = vld [vmem:[%s941_s3 + $0x80] sm:$0xf] }
  0x17   :  { %v549_v49 = vor.u32 %v623_v45, %v548_v44  ;;  %v621_v56 = vld [vmem:[%s941_s3 + $0x84] sm:$0xf0]  ;;  %v553_v57 = vor.u32 %v622_v50, %v550_v51  ;;  %v478_v59 = vld [vmem:[%s941_s3 + $0x8] sm:$0xf0]  ;;  %v620_v62 = vld [vmem:[%s941_s3 + $0x84] sm:$0xf] }
  0x18   :  { %v542_v63 = vld [vmem:[%s941_s3 + $0x88] sm:$0xf0]  ;;  %v541_v0 = vor.u32 %v621_v56, %v540_v55  ;;  %v154_v26 = vperm.slane %v703_v9, 2  ;;  %v193_v39 = vperm.slane %v698_v8, 3  ;;  %v194_v40 = vperm.slane %v703_v9, 3 }
  0x19   :  { %385 = vmatpush.bf16.msrb.mxu2 %v505_v25  ;;  %v545_v3 = vor.u32 %v620_v62, %v542_v63 }
  0x1a   :  { %357 = vmatpush.bf16.msrb.mxu0 %v517_v54  ;;  %370 = vmatpush.bf16.msrb.mxu1 %v581_v58  ;;  %v605_v54 = vld [vmem:[%s941_s3 + $0x4] sm:$0xf0]  ;;  %v604_v58 = vld [vmem:[%s941_s3 + $0x4] sm:$0xf] }
  0x1b   :  { %v477_v61 = vor.u32 %v605_v54, %v476_v52  ;;  %v481_v1 = vor.u32 %v604_v58, %v478_v59 }
  0x1d   :  { %386 = vmatpush.bf16.msrb.mxu2 %v497_v37 }
  0x1e   :  { %358 = vmatpush.bf16.msrb.mxu0 %v509_v2  ;;  %371 = vmatpush.bf16.msrb.mxu1 %v573_v6 }
  0x21   :  { %387 = vmatpush.bf16.msrb.mxu2 %v489_v53 }
  0x25   :  { %388 = vmatpush.bf16.msrb.mxu2 %v481_v1 }
  0x8a   :  { %v105_v12 = vpop.f32.mrf.mxu2 }
  0x8b   :  { %v707_v13 = vadd.f32 %v105_v12, %v80_v10  ;;  %v118_v14 = vpop.f32.mrf.mxu3  ;;  %v628_v10 = vld [vmem:[%s941_s3 + $0xc4] sm:$0xf] }
  0x8c   :  { %v709_v15 = vadd.f32 %v118_v14, %v81_v11  ;;  %v574_v11 = vld [vmem:[%s941_s3 + $0xc8] sm:$0xf0]  ;;  %v32_v12 = vld [vmem:[%s942_s1] sm:$0xff] }
  0x8d   :  { %v125_v18 = vmul.f32 %v707_v13, %v707_v13  ;;  %v577_v14 = vor.u32 %v628_v10, %v574_v11 }
  0x8e   :  { %v122_v16 = vadd.f32 %v709_v15, %v707_v13  ;;  %v126_v19 = vmul.f32 %v709_v15, %v709_v15 }
  0x8f   :  { %397 = vmatpush.bf16.msrb.mxu3 %v577_v14 }
  0x90   :  { %123 = vadd.xlane.f32.xlu0 %v122_v16  ;;  %v127_v21 = vadd.f32 %v126_v19, %v125_v18  ;;  %v33_v16 = vpack.c.bf16 %v32_v12, %v32_v12  ;;  %v611_v18 = vld [vmem:[%s941_s3 + $0x34] sm:$0xf0]  ;;  %v564_v19 = vld [vmem:[%s941_s3 + $0xb0] sm:$0xf] }
  0x92   :  { %v107_v17 = vpop.f32.mrf.mxu2  ;;  %462 = vmatmul.msk.bf16.vlgmr.msra.gmra.mxu0 %vm41_vm2, %v33_v16  ;;  %463 = vmatmul.msk.bf16.vlgmr.msra.gmra.mxu1 %vm41_vm2, %v33_v16 }
  0x93   :  { %v120_v20 = vpop.f32.mrf.mxu3  ;;  %v500_v17 = vld [vmem:[%s941_s3 + $0x30] sm:$0xf]  ;;  %398 = vmatpush.bf16.msrb.mxu3 %v569_v28 }
  0x94   :  { %v501_v20 = vor.u32 %v611_v18, %v500_v17 }
  0x96   :  { %359 = vmatpush.bf16.msrb.mxu0 %v501_v20  ;;  %v149_v20 = vperm.slane %v698_v8, 1 }
  0x97   :  { %399 = vmatpush.bf16.msrb.mxu3 %v561_v42 }
  0x98   :  { %128 = vadd.xlane.f32.xlu0 %v127_v21  ;;  %v627_v21 = vld [vmem:[%s941_s3 + $0xb4] sm:$0xf0] }
  0x99   :  { %v565_v24 = vor.u32 %v627_v21, %v564_v19  ;;  %v150_v21 = vperm.slane %v703_v9, 1 }
  0x9a   :  { %360 = vmatpush.bf16.msrb.mxu0 %v493_v32 }
  0x9b   :  { %372 = vmatpush.bf16.msrb.mxu1 %v565_v24  ;;  %400 = vmatpush.bf16.msrb.mxu3 %v553_v57  ;;  %v153_v24 = vperm.slane %v698_v8, 2 }
  0x9e   :  { %361 = vmatpush.bf16.msrb.mxu0 %v485_v46 }
  0x9f   :  { %373 = vmatpush.bf16.msrb.mxu1 %v557_v36  ;;  %401 = vmatpush.bf16.msrb.mxu3 %v545_v3  ;;  %v36_v3 = vperm.slane %v703_v9, 6 }
  0xa2   :  { %362 = vmatpush.bf16.msrb.mxu0 %v477_v61 }
  0xa3   :  { %374 = vmatpush.bf16.msrb.mxu1 %v549_v49 }
  0xa7   :  { %375 = vmatpush.bf16.msrb.mxu1 %v541_v0 }
 0x103   :  { %v124_v41 = vpop.xlane.xlu0 %123 }
 0x104   :  { %v130_v60 = vmul.f32 0.00390625, %v124_v41 }
 0x106   :  { %v132_v4 = vmul.f32 %v130_v60, %v130_v60  ;;  %v134_v18 = vsub.f32 %v707_v13, %v130_v60  ;;  %v135_v19 = vsub.f32 %v709_v15, %v130_v60 }
 0x10b   :  { %v129_v2 = vpop.xlane.xlu0 %128 }
 0x10c   :  { %v131_v5 = vmul.f32 0.00390625, %v129_v2  ;;  %v35_v2 = vperm.slane %v698_v8, 6 }
 0x10e   :  { %v133_v6 = vsub.f32 %v131_v5, %v132_v4 }
 0x10f   :  { %v59_v33 = vpop.f32.mrf.mxu0  ;;  %v72_v34 = vpop.f32.mrf.mxu1 }
 0x110   :  { %v136_v7 = vadd.f32 1e-05, %v133_v6 }
 0x112   :  { %636 = vrsqrt.f32 %v136_v7  ;;  %vm143_vm4 = vweird.f32 %v136_v7 }
 0x117   :  { %v61_v35 = vpop.f32.mrf.mxu0  ;;  %v74_v36 = vpop.f32.mrf.mxu1 }
 0x118   :  { %v637_v10 = vpop.eup %636 }
 0x119   :  { %v138_v11 = vmul.f32 %v637_v10, %v136_v7  ;;  %vm144_vm3 = vweird.f32 %v637_v10 }
 0x11a   :  { %vm145_vm5 = vmor %vm143_vm4, %vm144_vm3 }
 0x11b   :  { %v139_v12 = vmul.f32 %v637_v10, %v138_v11  ;;  %v435_v11 = vperm.slane %v703_v9, 4 }
 0x11d   :  { %v140_v14 = vmul.f32 0.5, %v139_v12  ;;  %v60_v12 = vadd.f32 %v59_v33, %v35_v2 }
 0x11f   :  { %v141_v16 = vsub.f32 1.5, %v140_v14  ;;  %v73_v14 = vadd.f32 %v72_v34, %v36_v3  ;;  %v454_v34 = vstv %s943_s6 }
 0x121   :  { %v142_v17 = vmul.f32 %v637_v10, %v141_v16 }
 0x123   :  { %v146_v22 = vsel %vm145_vm5, %v637_v10, %v142_v17  ;;  %v434_v10 = vperm.slane %v698_v8, 4 }
 0x124   :  { %v147_v23 = vmul.f32 %v146_v22, %v134_v18  ;;  %v148_v25 = vmul.f32 %v146_v22, %v135_v19  ;;  %v438_v19 = vperm.slane %v698_v8, 5 }
 0x126   :  { %v151_v27 = vmul.f32 %v149_v20, %v147_v23  ;;  %v152_v28 = vmul.f32 %v150_v21, %v148_v25  ;;  %v439_v20 = vperm.slane %v703_v9, 5  ;;  %v76_v23 = vmax.f32 %v60_v12, 0.0 }
 0x128   :  { %v155_v29 = vadd.f32 %v153_v24, %v151_v27  ;;  %v156_v30 = vadd.f32 %v154_v26, %v152_v28  ;;  %v77_v24 = vmax.f32 %v73_v14, 0.0 }
 0x12a   :  { %v157_v31 = vmax.f32 %v155_v29, 0.0  ;;  %v158_v13 = vmax.f32 %v156_v30, 0.0  ;;  %v446_v29 = vperm.slane %v698_v8, 7  ;;  %v447_v30 = vperm.slane %v703_v9, 7 }
 0x12c   :  { %v159_v32 = vpack.c.bf16 %v157_v31, %v157_v31  ;;  %v160_v15 = vpack.c.bf16 %v158_v13, %v158_v13 }
 0x12e   :  { %363 = vmatmul.bf16.vlgmr.msrb.gmra.mxu0 %v159_v32  ;;  %376 = vmatmul.bf16.vlgmr.msrb.gmra.mxu1 %v160_v15 }
 0x12f   :  { %389 = vmatmul.bf16.vlgmr.msrb.gmra.mxu2 %v159_v32  ;;  %402 = vmatmul.bf16.vlgmr.msrb.gmra.mxu3 %v160_v15 }
 0x1ab   :  { %v364_v37 = vpop.f32.mrf.mxu0  ;;  %v377_v38 = vpop.f32.mrf.mxu1 }
 0x1ac   :  { %v365_v41 = vadd.f32 %v364_v37, %v193_v39 }
 0x1ae   :  { %v378_v47 = vadd.f32 %v377_v38, %v365_v41 }
 0x1b0   :  { %v410_v53 = vmul.f32 %v378_v47, %v378_v47 }
 0x1b2   :  { %v390_v42 = vpop.f32.mrf.mxu2  ;;  %v403_v43 = vpop.f32.mrf.mxu3 }
 0x1b3   :  { %v391_v44 = vadd.f32 %v390_v42, %v194_v40  ;;  %v366_v45 = vpop.f32.mrf.mxu0  ;;  %v379_v46 = vpop.f32.mrf.mxu1 }
 0x1b5   :  { %v404_v48 = vadd.f32 %v403_v43, %v391_v44 }
 0x1b7   :  { %v407_v49 = vadd.f32 %v404_v48, %v378_v47  ;;  %v411_v52 = vmul.f32 %v404_v48, %v404_v48 }
 0x1b9   :  { %408 = vadd.xlane.f32.xlu1 %v407_v49  ;;  %v412_v54 = vadd.f32 %v411_v52, %v410_v53 }
 0x1ba   :  { %v392_v50 = vpop.f32.mrf.mxu2  ;;  %v405_v51 = vpop.f32.mrf.mxu3 }
 0x1c1   :  { %413 = vadd.xlane.f32.xlu1 %v412_v54 }
 0x22c   :  { %v409_v55 = vpop.xlane.xlu1 %408 }
 0x22d   :  { %v415_v56 = vmul.f32 0.00390625, %v409_v55 }
 0x22f   :  { %v417_v58 = vmul.f32 %v415_v56, %v415_v56  ;;  %v419_v6 = vsub.f32 %v378_v47, %v415_v56  ;;  %v420_v7 = vsub.f32 %v404_v48, %v415_v56 }
 0x234   :  { %v414_v57 = vpop.xlane.xlu1 %413 }
 0x235   :  { %v416_v59 = vmul.f32 0.00390625, %v414_v57 }
 0x237   :  { %v418_v60 = vsub.f32 %v416_v59, %v417_v58 }
 0x239   :  { %v421_v61 = vadd.f32 1e-05, %v418_v60 }
 0x23b   :  { %638 = vrsqrt.f32 %v421_v61  ;;  %vm428_vm7 = vweird.f32 %v421_v61 }
 0x241   :  { %v639_v62 = vpop.eup %638 }
 0x242   :  { %v423_v63 = vmul.f32 %v639_v62, %v421_v61  ;;  %vm429_vm6 = vweird.f32 %v639_v62 }
 0x243   :  { %vm430_vm8 = vmor %vm428_vm7, %vm429_vm6 }
 0x244   :  { %v424_v0 = vmul.f32 %v639_v62, %v423_v63 }
 0x246   :  { %v425_v1 = vmul.f32 0.5, %v424_v0 }
 0x248   :  { %v426_v4 = vsub.f32 1.5, %v425_v1 }
 0x24a   :  { %v427_v5 = vmul.f32 %v639_v62, %v426_v4 }
 0x24c   :  { %v431_v16 = vsel %vm430_vm8, %v639_v62, %v427_v5 }
 0x24d   :  { %v432_v17 = vmul.f32 %v431_v16, %v419_v6  ;;  %v433_v18 = vmul.f32 %v431_v16, %v420_v7 }
 0x24f   :  { %v436_v21 = vmul.f32 %v434_v10, %v432_v17  ;;  %v437_v22 = vmul.f32 %v435_v11, %v433_v18 }
 0x251   :  { %v440_v25 = vadd.f32 %v438_v19, %v436_v21  ;;  %v441_v26 = vadd.f32 %v439_v20, %v437_v22 }
 0x253   :  { %v442_v27 = vadd.f32 %v440_v25, %v76_v23  ;;  %v443_v28 = vadd.f32 %v441_v26, %v77_v24 }
 0x255   :  { %v444_v31 = vmax.f32 %v442_v27, 0.0  ;;  %v445_v13 = vmax.f32 %v443_v28, 0.0 }
 0x257   :  { %v448_v32 = vmul.f32 %v446_v29, %v444_v31  ;;  %v449_v15 = vmul.f32 %v447_v30, %v445_v13 }
 0x259   :  { %v450_v33 = vadd.f32 %v449_v15, %v448_v32 }
 0x25b   :  { %451 = vadd.xlane.f32.xlu2 %v450_v33 }
 0x2ce   :  { %v452_v35 = vpop.xlane.xlu2 %451 }
 0x2cf   :  { %v455_v36 = vadd.f32 %v454_v34, %v452_v35 }
 0x2d1   :  { %457 = vst.msk [vmem:[%s944_s7] sm:$0xff] %vm456_vm9, %v455_v36 }

</bundles_post_ra>
